<compile_context>
chip_gen: v5e
topology: v5e:2x2
jax: 0.10.0
libtpu: 0.0.40
codegen_flags: <defaults>
</compile_context>

<pallas_src>
import math
from typing import Any, Dict, List, Sequence, Union

import jax
import jax.numpy as jnp
from jax.experimental import pallas as pl
from jax.experimental.pallas import tpu as pltpu

_LANE = 128


def _cdiv(a: int, b: int) -> int:
    return -(-a // b)


def _round_up(a: int, b: int) -> int:
    return _cdiv(a, b) * b


# ----------------------------------------------------------------------------
# Pallas kernel: gather ragged chunks + fill the pad tail (lane-dense layout)
# ----------------------------------------------------------------------------
def _make_pad_gather_kernel(pad_value, chunk_rows: int):
    chunk_elems = chunk_rows * _LANE

    def kernel(off_ref, cnt_ref, len_ref, src_ref, out_ref):
        # off_ref / cnt_ref / len_ref : SMEM int32[B] (scalar prefetch)
        #   off_ref[b] : first chunk index of item b in the flat concat buffer
        #   cnt_ref[b] : number of chunks item b actually occupies
        #   len_ref[b] : item b's valid flat length (in elements)
        # src_ref : (chunk_rows, 128) chunk fetched via the data-dependent index_map
        # out_ref : (chunk_rows, 128) = chunk j of batch element b in the padded output
        b = pl.program_id(0)
        j = pl.program_id(1)
        n = len_ref[b]
        row = jax.lax.broadcasted_iota(jnp.int32, (chunk_rows, _LANE), 0)
        lane = jax.lax.broadcasted_iota(jnp.int32, (chunk_rows, _LANE), 1)
        flat = j * chunk_elems + row * _LANE + lane            # global flat position
        pad = jnp.asarray(pad_value, out_ref.dtype)
        out_ref[...] = jnp.where(flat < n, src_ref[...], pad)

    return kernel


def _pad_gather_pallas(flat2d, chunk_off, chunk_cnt, lengths, *,
                       n_batch, n_out_chunks, chunk_rows, pad_value):
    dtype = flat2d.dtype
    itemsize = jnp.dtype(dtype).itemsize
    out_rows = n_out_chunks * chunk_rows
    block_bytes = chunk_rows * _LANE * itemsize

    grid_spec = pltpu.PrefetchScalarGridSpec(
        num_scalar_prefetch=3,
        grid=(n_batch, n_out_chunks),
        in_specs=[
            pl.BlockSpec(
                (chunk_rows, _LANE),
                # Data-dependent gather: chunk j of item b lives at chunk index
                # off[b] + j in the flat concat buffer.  Clamp to the item's last
                # chunk so fully-padded trailing chunks revisit the same block and
                # Pallas skips the (useless) HBM fetch.
                lambda b, j, off, cnt, lens: (off[b] + jnp.minimum(j, cnt[b] - 1), 0),
            )
        ],
        out_specs=pl.BlockSpec(
            (None, chunk_rows, _LANE), lambda b, j, off, cnt, lens: (b, j, 0)
        ),
    )

    cost = pl.CostEstimate(
        flops=0,
        transcendentals=0,
        bytes_accessed=int(flat2d.size * itemsize
                           + n_batch * out_rows * _LANE * itemsize),
    )

    return pl.pallas_call(
        _make_pad_gather_kernel(pad_value, chunk_rows),
        out_shape=jax.ShapeDtypeStruct((n_batch, out_rows, _LANE), dtype),
        grid_spec=grid_spec,
        compiler_params=pltpu.CompilerParams(
            # batch axis is embarrassingly parallel (v7x: shards across both TCs);
            # chunk axis stays "arbitrary" so consecutive clamped indices can skip DMA.
            dimension_semantics=("parallel", "arbitrary"),
            # Explicit limit: double-buffered in+out blocks (<= ~1 MiB total here) fit
            # comfortably under v7x's 64 MiB physical VMEM as well as v5e/v6e.
            vmem_limit_bytes=int(max(16 * 1024 * 1024, 8 * block_bytes)),
        ),
        cost_estimate=cost,
    )(chunk_off, chunk_cnt, lengths, flat2d)


# ----------------------------------------------------------------------------
# Glue: pad a ragged list of arrays via the kernel
# ----------------------------------------------------------------------------
def _pad_sequence(items: List[jax.Array], pad_value) -> jax.Array:
    """Pad a list of arrays (ragged leading dim, equal trailing dims) with pad_value."""
    items = [jnp.atleast_1d(it) for it in items]
    ndim = items[0].ndim
    if any(it.ndim != ndim for it in items):
        raise ValueError("_pad_sequence: items must share the same number of dims")
    trailing = tuple(int(s) for s in items[0].shape[1:])
    if any(tuple(int(s) for s in it.shape[1:]) != trailing for it in items):
        # TODO(synk): nested raggedness (pad_sequence_rec) not implemented.
        raise ValueError("_pad_sequence: trailing dims must match across items")

    dtype = items[0].dtype
    itemsize = jnp.dtype(dtype).itemsize
    batch = len(items)
    t_max = max(int(it.shape[0]) for it in items)
    d_flat = math.prod(trailing) if trailing else 1
    m = t_max * d_flat                                   # flat padded length per item

    # Chunk granularity: sublane-packing multiple for the dtype (8 for 32-bit, 16 for
    # bf16, 32 for int8/bool), grown toward 512 rows so blocks amortize per-grid-step
    # overhead, but never bigger than one item's worth of output.
    sub = max(8, 32 // itemsize)
    r_needed = max(1, _cdiv(m, _LANE))
    chunk_rows = min(_round_up(r_needed, sub), 512)
    chunk_elems = chunk_rows * _LANE
    n_out_chunks = max(1, _cdiv(m, chunk_elems))

    lens = [int(math.prod(it.shape)) for it in items]          # flat valid lengths
    cnts = [max(1, _cdiv(n, chunk_elems)) for n in lens]       # chunks each item occupies
    offs, acc = [], 0
    for c in cnts:
        offs.append(acc)
        acc += c

    # One tight, lane-dense concat buffer (each item padded only up to its own chunk
    # boundary -- no [B, T_max, D] slab, no sentinel fill).
    flat_items = []
    for it, n, c in zip(items, lens, cnts):
        f = jnp.ravel(it)
        flat_items.append(jnp.pad(f, (0, c * chunk_elems - n)))
    flat2d = jnp.concatenate(flat_items, axis=0).reshape(-1, _LANE)

    out3 = _pad_gather_pallas(
        flat2d,
        jnp.asarray(offs, jnp.int32),
        jnp.asarray(cnts, jnp.int32),
        jnp.asarray(lens, jnp.int32),
        n_batch=batch,
        n_out_chunks=n_out_chunks,
        chunk_rows=chunk_rows,
        pad_value=pad_value,
    )
    flat_out = out3.reshape(batch, n_out_chunks * chunk_elems)[:, :m]
    return flat_out.reshape((batch, t_max) + trailing)


# ----------------------------------------------------------------------------
# PadCollateDict semantics on top of the kernel
# ----------------------------------------------------------------------------
class PadCollateDict:
    """Collate list of dicts into a dict of batched arrays WITH auto-padding."""

    def __init__(
        self,
        pad_values: Dict[str, Union[int, float]],
        skip_unknown_key: bool = True,
        exclude_keys: Sequence[str] = (),
    ) -> None:
        self._pad_values = pad_values
        self._skip_unknown_key = skip_unknown_key
        self._exclude_keys = exclude_keys

    def __call__(self, items_lst: List[Dict[str, Any]]) -> Dict[str, Any]:
        keys = [k for k in items_lst[0].keys() if k not in self._exclude_keys]
        for item in items_lst[1:]:
            keys = [k for k in keys if k in item.keys()]
        batch: Dict[str, Any] = {}
        for key in keys:
            items = [item[key] for item in items_lst]
            if all(isinstance(it, (int, float, str)) for it in items):
                pass  # spec keeps python scalars / strings as a plain list
            elif all(isinstance(it, jnp.ndarray) for it in items):
                shapes_py = [tuple(int(s) for s in it.shape) for it in items]
                if len(set(len(s) for s in shapes_py)) != 1:
                    continue
                shape_key = f"{key}_shape"
                if not key.endswith("_shape") and shape_key not in self._exclude_keys:
                    if shape_key not in batch:
                        batch[shape_key] = jnp.asarray(shapes_py, dtype=jnp.int32)
                if all(s == shapes_py[0] for s in shapes_py):
                    # Equal shapes: nothing to pad -- plain stack, no kernel round-trip.
                    items = jnp.stack(items, axis=0)
                elif key in self._pad_values:
                    items = _pad_sequence(items, self._pad_values[key])
                elif self._skip_unknown_key:
                    pass
                else:
                    continue
            else:
                # TODO(synk): nested list/tuple raggedness (pad_sequence_rec) not implemented.
                continue
            batch[key] = items
        return batch


# ----------------------------------------------------------------------------
# Demo / self-check
# ----------------------------------------------------------------------------
if __name__ == "__main__":
    key = jax.random.PRNGKey(0)
    B, D = 4, 32
    feat_lens = [3, 8, 5, 8]
    tok_lens = [2, 6, 4, 5]

    items_lst = []
    for b in range(B):
        key, k1, k2, k3 = jax.random.split(key, 4)
        items_lst.append(
            {
                "audio": jax.random.normal(k1, (feat_lens[b], D), dtype=jnp.float32),
                "captions": jax.random.randint(k2, (tok_lens[b],), 1, 100, dtype=jnp.int32),
                "embedding": jax.random.normal(k3, (8,), dtype=jnp.float32),  # equal shapes
                "index": b,
                "fname": f"clip_{b}.wav",
            }
        )

    collate = PadCollateDict(pad_values={"audio": -1.0, "captions": 0})
    batch = collate(items_lst)
    jax.block_until_ready(batch["audio"])
    jax.block_until_ready(batch["captions"])
    jax.block_until_ready(batch["embedding"])

    # Reference check (plain JAX padding)
    T_max = max(feat_lens)
    ref_audio = jnp.full((B, T_max, D), -1.0, dtype=jnp.float32)
    for b in range(B):
        ref_audio = ref_audio.at[b, : feat_lens[b], :].set(items_lst[b]["audio"])
    L_max = max(tok_lens)
    ref_tok = jnp.zeros((B, L_max), dtype=jnp.int32)
    for b in range(B):
        ref_tok = ref_tok.at[b, : tok_lens[b]].set(items_lst[b]["captions"])
    ref_emb = jnp.stack([it["embedding"] for it in items_lst])

    assert batch["audio"].shape == (B, T_max, D)
    assert jnp.allclose(batch["audio"], ref_audio)
    assert jnp.array_equal(batch["captions"], ref_tok)
    assert jnp.allclose(batch["embedding"], ref_emb)
    assert jnp.array_equal(
        batch["audio_shape"], jnp.asarray([[l, D] for l in feat_lens], jnp.int32)
    )
    assert jnp.array_equal(
        batch["captions_shape"], jnp.asarray([[l] for l in tok_lens], jnp.int32)
    )
    assert jnp.array_equal(batch["embedding_shape"], jnp.full((B, 1), 8, jnp.int32))
    assert batch["index"] == list(range(B))
    assert batch["fname"] == [f"clip_{b}.wav" for b in range(B)]

    print("KERNEL_OK")
</pallas_src>

<mosaic_0001>
module attributes {stable_mosaic.version = 11 : i64} {
  func.func @kernel(%arg0: i32, %arg1: i32, %arg2: memref<4xi32, #tpu.memory_space<smem>>, %arg3: memref<4xi32, #tpu.memory_space<smem>>, %arg4: memref<4xi32, #tpu.memory_space<smem>>, %arg5: memref<8x128xf32, #tpu.memory_space<vmem>>, %arg6: memref<1x8x128xf32, #tpu.memory_space<vmem>>) attributes {dimension_semantics = [#tpu.dimension_semantics<parallel>, #tpu.dimension_semantics<arbitrary>], iteration_bounds = array<i64: 4, 1>, scalar_prefetch = 3 : i64, scratch_operands = 0 : i64, tpu.core_type = #tpu.core_type<tc>, window_params = [{transform_indices = @transform_0, window_bounds = array<i64: 8, 128>}, {transform_indices = @transform_1, window_bounds = array<i64: 1, 8, 128>}]} {
    %0 = arith.index_cast %arg0 : i32 to index
    %1 = memref.load %arg4[%0] : memref<4xi32, #tpu.memory_space<smem>>
    %2 = tpu.iota {dimensions = array<i32: 0>} : vector<8x128xi32>
    %3 = tpu.iota {dimensions = array<i32: 1>} : vector<8x128xi32>
    %c1024_i32 = arith.constant 1024 : i32
    %4 = arith.muli %arg1, %c1024_i32 : i32
    %c128_i32 = arith.constant 128 : i32
    %5 = vector.broadcast %c128_i32 : i32 to vector<8x128xi32>
    %6 = arith.muli %2, %5 : vector<8x128xi32>
    %7 = vector.broadcast %4 : i32 to vector<8x128xi32>
    %8 = arith.addi %7, %6 : vector<8x128xi32>
    %9 = arith.addi %8, %3 : vector<8x128xi32>
    %10 = vector.broadcast %1 : i32 to vector<8x128xi32>
    %11 = arith.cmpi slt, %9, %10 : vector<8x128xi32>
    %c0 = arith.constant 0 : index
    %c0_0 = arith.constant 0 : index
    %12 = vector.load %arg5[%c0, %c0_0] : memref<8x128xf32, #tpu.memory_space<vmem>>, vector<8x128xf32>
    %cst = arith.constant -1.000000e+00 : f32
    %13 = vector.broadcast %cst : f32 to vector<8x128xf32>
    %14 = arith.select %11, %12, %13 : vector<8x128xi1>, vector<8x128xf32>
    %c0_1 = arith.constant 0 : index
    %c0_2 = arith.constant 0 : index
    %c0_3 = arith.constant 0 : index
    %15 = vector.load %arg6[%c0_1, %c0_2, %c0_3] : memref<1x8x128xf32, #tpu.memory_space<vmem>>, vector<1x8x128xf32>
    %16 = vector.shape_cast %15 : vector<1x8x128xf32> to vector<8x128xf32>
    %17 = vector.shape_cast %14 : vector<8x128xf32> to vector<1x8x128xf32>
    tpu.vector_store %arg6[%c0_1, %c0_2, %c0_3], %17 {strides = array<i32>} : memref<1x8x128xf32, #tpu.memory_space<vmem>>, vector<1x8x128xf32>,
    return
  }
  func.func @transform_0(%arg0: i32, %arg1: i32, %arg2: memref<4xi32, #tpu.memory_space<smem>>, %arg3: memref<4xi32, #tpu.memory_space<smem>>, %arg4: memref<4xi32, #tpu.memory_space<smem>>) -> (i32, i32) {
    %0 = arith.index_cast %arg0 : i32 to index
    %1 = memref.load %arg2[%0] : memref<4xi32, #tpu.memory_space<smem>>
    %2 = arith.index_cast %arg0 : i32 to index
    %3 = memref.load %arg3[%2] : memref<4xi32, #tpu.memory_space<smem>>
    %c1_i32 = arith.constant 1 : i32
    %4 = arith.subi %3, %c1_i32 : i32
    %5 = arith.minsi %arg1, %4 : i32
    %6 = arith.addi %1, %5 : i32
    %c0_i32 = arith.constant 0 : i32
    %c0_i32_0 = arith.constant 0 : i32
    return %6, %c0_i32 : i32, i32
  }
  func.func @transform_1(%arg0: i32, %arg1: i32, %arg2: memref<4xi32, #tpu.memory_space<smem>>, %arg3: memref<4xi32, #tpu.memory_space<smem>>, %arg4: memref<4xi32, #tpu.memory_space<smem>>) -> (i32, i32, i32) {
    %c0_i32 = arith.constant 0 : i32
    %c0_i32_0 = arith.constant 0 : i32
    return %arg0, %arg1, %c0_i32 : i32, i32, i32
  }
}

</mosaic_0001>

<bundles_post_ra>
// kernel: tpu_custom_call.1
= control target key start
LH: loop header
LB: loop body
LE: loop exit
PB: predicated region body
PF: predicated region fallthrough
CT: control target
= control target key end

     0   :  { %s597_s21 = smov [#allocation3]   ;;  %s598_s22 = smov [#allocation4]   ;;  %s803_s0 = inlined_call_operand.hbm [shape: s32[4], index: 0, kind: input, shape index: {}]   ;;  %s804_s3 = inlined_call_operand.hbm [shape: f32[32,128], index: 3, kind: input, shape index: {}]   ;;  %s805_s4 = inlined_call_operand.hbm [shape: f32[4,8,128], index: 4, kind: output, shape index: {}]   ;;  %s806_s1 = inlined_call_operand.hbm [shape: s32[4], index: 1, kind: input, shape index: {}]   ;;  %s807_s2 = inlined_call_operand.vmem [shape: s32[4], index: 2, kind: input, shape index: {}]  }
   0x1   :  { %s10_s17 = sshll.u32 %s803_s0, 4  ;;  %s15_s20 = sshll.u32 %s806_s1, 4  ;;  %s11_s17 = int_to_ptr.hbm [resolvable:$true] %s10_s17  ;;  %s16_s20 = int_to_ptr.hbm [resolvable:$true] %s15_s20 }
   0x2   :  { %13 = dma.hbm_to_smem %s11_s17, 16, %s597_s21, [#allocation2] }
   0x3   :  { %18 = dma.hbm_to_smem %s16_s20, 16, %s598_s22, [#allocation2] }
   0x4   :  { %s20_s25 = sshll.u32 %s807_s2, 4  ;;  %s599_s26 = smov [#allocation5]   ;;  %s21_s25 = int_to_ptr.vmem [resolvable:$true] %s20_s25 }
   0x5   :  { %23 = dma.vmem_to_smem %s21_s25, 16, %s599_s26, [#allocation2] }
   0x6   :  { %551 = dma.done.wait [#allocation2], 48 }
   0x7   :  { %552 = vsyncadd [#allocation2], 4294967248 }
   0x8   :  { %26 = sfence }
   0x9   :  { %27 = vsyncpa [#allocation7], 0 }
   0xa   :  { %29 = vsyncpa [#allocation7 + $0x1], 0 }
   0xb   :  { %30 = vsyncpa [#allocation8], 0 }
   0xc   :  { %32 = vsyncpa [#allocation8 + $0x1], 0  ;;  %s634_s0 = smov 0   ;;  %s636_s1 = smov 0  }
   0xd   :  { %s638_s27 = smov 0   ;;  %s640_s28 = smov 0  }
   0xe   :  { %s642_s29 = smov 0   ;;  %s644_s2 = smov 0  }
   0xf   :  { %s646_s30 = smov 0   ;;  %s648_s5 = smov 0  }
  0x10   :  { %s650_s6 = smov 0  }
  0x11 LB: > { %811 = sst [smem:[#allocation17_spill]] %s583_s2  ;;  %s305_s7 = sadd.s32 4294967295, %s595_s6   ;;  %s595_s6 = sphi %s650_s6, %s38_s6   ;;  %s591_s5 = sphi %s648_s5, %s823_s5   ;;  %s587_s30 = sphi %s646_s30, %s822_s30   ;;  %s583_s2 = sphi %s644_s2, %s821_s2   ;;  %s579_s29 = sphi %s642_s29, %s828_s29   ;;  %s575_s28 = sphi %s640_s28, %s827_s28   ;;  %s571_s27 = sphi %s638_s27, %s826_s27   ;;  %s567_s1 = sphi %s636_s1, %s825_s1   ;;  %s563_s0 = sphi %s634_s0, %s824_s0  }
  0x12   : > { %812 = sst [smem:[#allocation18_spill]] %s591_s5  ;;  %s306_s8 = sadd.s32 4294967294, %s595_s6  }
  0x13   : > { %s50_s9 = sadd.s32 1, %s591_s5  ;;  %s55_s10 = sld [smem:[#allocation4 + %s591_s5]] }
  0x14   : > { %p52_p0 = scmp.ge.s32.totalorder %s50_s9, 4  ;;  %s54_s11 = sld [smem:[#allocation3 + %s591_s5]] }
  0x15   : > { %s69_s12 = sadd.s32 1, %s583_s2  ;;  %p76_p1 = scmp.ne.s32.totalorder %s583_s2, %s579_s29 }
  0x16   : > { %s830_s9 = smov (%p52_p0, %s50_s9), 0  ;;  %p82_p2 = scmp.ne.s32.totalorder %s579_s29, %s575_s28 }
  0x17   : > { %813 = sst [smem:[#allocation19_spill]] %s830_s9  ;;  %p83_p3 = scmp.eq.s32.totalorder %s305_s7, 0 }
  0x18   : > { %s60_s13 = sld [smem:[#allocation3 + %s830_s9]]  ;;  %p77_p4 = scmp.eq.s32.totalorder %s595_s6, 0 }
  0x19   : > { %s61_s14 = sld [smem:[#allocation4 + %s830_s9]]  ;;  %s307_s15 = sadd.s32 4294967295, %s55_s10 }
  0x1a   : > { %p691_p5 = por %p83_p3, %p82_p2  ;;  %p308_p6 = scmp.gt.s32.totalorder %s307_s15, 0 }
  0x1b   : > { %s92_s17 = ssub.s32 %s591_s5, %s830_s9  ;;  %s97_s18 = sadd.s32 1, %s571_s27 }
  0x1c   : > { %p95_p7 = scmp.eq.s32.totalorder %s92_s17, 0  ;;  %s832_s15 = smov (%p308_p6, %s307_s15), 0 }
  0x1d   : > { %s59_s20 = sadd.s32 %s832_s15, %s54_s11  ;;  %p107_p9 = scmp.ne.s32.totalorder %s571_s27, %s567_s1 }
  0x1e   : > { %s699_s19 = scalar_select %p95_p7, %s571_s27, %s97_s18  }
  0x1f   : > { %s309_s21 = sadd.s32 4294967295, %s61_s14  ;;  %p108_p10 = scmp.eq.s32.totalorder %s305_s7, 3 }
  0x20   : > { %p310_p8 = scmp.gt.s32.totalorder %s309_s21, 0  ;;  %p113_p11 = scmp.ne.s32.totalorder %s567_s1, %s563_s0 }
  0x21   : > { %p705_p12 = por %p108_p10, %p107_p9  ;;  %p114_p13 = scmp.eq.s32.totalorder %s306_s8, 3 }
  0x22   : > { %s834_s21 = smov (%p310_p8, %s309_s21), 0  ;;  %p78_p3 = por %p77_p4, %p76_p1 }
  0x23   : > { %s65_s23 = sadd.s32 %s834_s21, %s60_s13  ;;  %p709_p0 = por %p114_p13, %p113_p11 }
  0x24   : > { %s66_s24 = ssub.s32 %s59_s20, %s65_s23  ;;  %p344_p6 = scmp.lt.s32.totalorder %s595_s6, 4 }
  0x25   : > { %p67_p2 = scmp.eq.s32.totalorder %s66_s24, 0  ;;  %p317_p8 = scmp.ge.s32.totalorder %s595_s6, 1 }
  0x26   : > { %s324_s28 = scalar_select %p78_p3, [#allocation3], [#allocation10] }
  0x27   : > { %s721_s26 = scalar_select %p67_p2, %s583_s2, %s69_s12  }
  0x28   : > { %s325_s7 = scalar_select %p78_p3, %s591_s5, 0 }
  0x29   : > { %817 = sst [smem:[#allocation20_spill]] %s721_s26  ;;  %p725_p7 = pnand %p344_p6, %p78_p3 }
  0x2a   : > { %s836_s7 = smov (!%p344_p6, %s325_s7), 0  ;;  %s838_s28 = smov (!%p344_p6, %s324_s28), [#allocation12] }
  0x2b   : > { %s326_s10 = scalar_select %p78_p3, [#allocation4], [#allocation11] }
  0x2c   : > { %p157_p9 = scmp.lt.s32.totalorder %s595_s6, 5  ;;  %s134_s13 = sand.u32 1, %s583_s2  }
  0x2d   : > { %s840_s10 = smov (!%p344_p6, %s326_s10), [#allocation13]  ;;  %s139_s12 = sld [smem:[%s838_s28 + %s836_s7]] }
  0x2e   : > { %s140_s11 = sld [smem:[%s840_s10 + %s836_s7]]  ;;  %p732_p10 = pnand %p317_p8, %p157_p9 }
  0x2f   : > { %s313_s15 = sshll.u32 %s134_s13, 3  ;;  %s135_s26 = scalar_lea.sflag [#allocation7], %s134_s13 }
  0x30   : > { %s138_s18 = scalar_lea.vmem [#allocation6], %s313_s15  ;;  %p461_p11 = pneg %p725_p7 }
  0x31   : > { %s152_s20 = sshll.u32 %s138_s18, 4  ;;  %s153_s20 = int_to_ptr.vmem [resolvable:$true] %s152_s20 }
  0x34   : > { %s314_s17 = sadd.s32 4294967295, %s140_s11 }
  0x35   : > { %p315_p1 = scmp.gt.s32.totalorder %s314_s17, 0 }
  0x37   : > { %s842_s17 = smov (%p315_p1, %s314_s17), 0 }
  0x38   : > { %s144_s21 = sadd.s32 %s842_s17, %s139_s12  ;;  %s464_s12 = scalar_lea.hbm %s804_s3, 32 }
  0x39   : > { %s316_s23 = sshll.u32 %s144_s21, 3 }
  0x3a   : > { %s148_s10 = scalar_lea.hbm %s804_s3, %s316_s23 }
  0x3b   : > { %s150_s5 = sshll.u32 %s148_s10, 4  ;;  %s151_s5 = int_to_ptr.hbm [resolvable:$true] %s150_s5 }
  0x3c   : > { %s457_s2 = sshra.s32 %s151_s5, 4  ;;  %s458_s2 = int_to_ptr.hbm [resolvable:$true] %s457_s2 }
  0x3d   : > { %s459_s28 = scalar_lea.hbm %s458_s2, 8  ;;  %p465_p3 = scmp.lt.s32.totalorder %s458_s2, %s804_s3 }
  0x3e   : > { %p460_p4 = scmp.ne.s32.totalorder %s458_s2, %s459_s28  ;;  %p466_p6 = scmp.lt.s32.totalorder %s464_s12, %s459_s28 }
  0x40   : > { %p462_p13 = pnand %p461_p11, %p460_p4  ;;  %p467_p8 = por %p466_p6, %p465_p3 }
  0x42   : > { %p463_p2 = pneg %p462_p13 }
  0x44   : > { %p468_p9 = pnand %p467_p8, %p463_p2 }
  0x46   : > { %471 = shalt.err (!%p468_p9)
}
  0x47   : > { %339 = dma.hbm_to_vmem [thread:$0]  (!%p725_p7), %s151_s5, 128, %s153_s20, %s135_s26  }
  0x48   : > { %161 = sbr.rel (%p732_p10) target bundleno = 94 (0x5e), region = 24  ;;  %s163_s9 = sand.u32 (!%p732_p10), 1, %s579_s29  }
  0x49   : > { %s318_s13 = sshll.u32 (!%p732_p10), %s163_s9, 3  ;;  %s164_s18 = scalar_lea.sflag (!%p732_p10), [#allocation7], %s163_s9 }
  0x4a   : > { %s167_s21 = scalar_lea.vmem (!%p732_p10), [#allocation6], %s318_s13 }
  0x4d   : > { %554 = dma.done.wait (%p691_p5), %s164_s18, 128  }
  0x4e   : > { %556 = vsyncadd (%p691_p5), %s164_s18, 4294967168  ;;  %s184_s2 = sand.u32 1, %s567_s1   ;;  %v194_v0 = vlaneseq  ;;  %s321_s5 = sshll.u32 %s587_s30, 3  ;;  %v205_v6 = vld [vmem:[%s167_s21] sm:$0xff] }
  0x4f   : > { %s193_s26 = sld [smem:[#allocation5 + %s587_s30]]  ;;  %s319_s8 = sshll.u32 %s184_s2, 3 }
  0x50   : > { %v195_v1 = vshrl.u32 %v194_v0, 7  ;;  %v197_v2 = vand.u32 127, %v194_v0  ;;  %s220_s23 = scalar_lea.hbm %s805_s4, %s321_s5  ;;  %s186_s24 = scalar_lea.vmem [#allocation9], %s319_s8 }
  0x51   : > { %s222_s10 = sshll.u32 %s186_s24, 4  ;;  %s224_s16 = sshll.u32 %s220_s23, 4  ;;  %s223_s10 = int_to_ptr.vmem [resolvable:$true] %s222_s10  ;;  %s225_s16 = int_to_ptr.hbm [resolvable:$true] %s224_s16 }
  0x52   : > { %v199_v3 = vmul.u32 128, %v195_v1  ;;  %s209_s30 = scalar_lea.sflag [#allocation8], %s184_s2  ;;  %s501_s28 = sshra.s32 %s225_s16, 4  ;;  %s502_s28 = int_to_ptr.hbm [resolvable:$true] %s501_s28 }
  0x53   : > { %s503_s7 = scalar_lea.hbm %s502_s28, 8  ;;  %s507_s15 = scalar_lea.hbm %s805_s4, 32 }
  0x54   : > { %v202_v4 = vadd.s32 %v199_v3, %v197_v2  ;;  %p504_p5 = scmp.ne.s32.totalorder %s502_s28, %s503_s7  ;;  %p508_p1 = scmp.lt.s32.totalorder %s502_s28, %s805_s4 }
  0x55   : > { %v203_v5 = vstv %s193_s26  ;;  %p509_p4 = scmp.lt.s32.totalorder %s507_s15, %s503_s7 }
  0x56   : > { %vm204_vm0 = vcmp.lt.s32.totalorder %v202_v4, %v203_v5  ;;  %p505_p7 = pnand %p504_p5, %p705_p12 }
  0x57   : > { %v206_v7 = vsel %vm204_vm0, %v205_v6, -1.0  ;;  %p510_p11 = por %p509_p4, %p508_p1 }
  0x58   : > { %207 = vst [vmem:[%s186_s24] sm:$0xff] %v206_v7  ;;  %p506_p10 = pneg %p505_p7 }
  0x5a   : > { %p511_p13 = pnand %p510_p11, %p506_p10 }
  0x5c   : > { %514 = shalt.err (!%p511_p13)
}
  0x5d   : > { %330 = dma.vmem_to_hbm [thread:$0]  (%p705_p12), %s223_s10, 128, %s225_s16, %s209_s30  }
  0x5e PF: > { %p345_p2 = scmp.ge.s32.totalorder %s595_s6, 2  ;;  %s236_s13 = sand.u32 1, %s563_s0  }
  0x5f   : > { %s237_s18 = scalar_lea.sflag [#allocation8], %s236_s13 }
  0x60   : > { %p341_p3 = pnand %p345_p2, %p709_p0 }
  0x62   : > { %p342_p6 = pneg %p341_p3 }
  0x64   : > { %558 = dma.done.wait (%p342_p6), %s237_s18, 128  }
  0x65   : > { %560 = vsyncadd (%p342_p6), %s237_s18, 4294967168  ;;  %s38_s6 = sadd.s32 1, %s595_s6   ;;  %s820_s22 = sld [smem:[#allocation17_spill]] }
  0x66   : > { %p35_p8 = scmp.ge.s32.totalorder %s38_s6, 6   ;;  %s821_s2 = sld [smem:[#allocation20_spill]] }
  0x67   : > { %s822_s30 = sld [smem:[#allocation18_spill]]  ;;  %s824_s0 = smov %s567_s1 }
  0x68   : > { %s823_s5 = sld [smem:[#allocation19_spill]]  ;;  %s825_s1 = smov %s571_s27 }
  0x69   : > { %s826_s27 = smov %s699_s19  ;;  %s827_s28 = smov %s579_s29 }
  0x6a   :  { %37 = sbr.rel (!%p35_p8) target bundleno = 17 (0x11), region = 69 }
  0x6b   : > { %s828_s29 = smov %s820_s22 }
  0x6f   :  { %243 = vsyncpa [#allocation7], 1 }
  0x70   :  { %245 = vsyncpa [#allocation7 + $0x1], 1 }
  0x71   :  { %246 = vsyncpa [#allocation8], 1 }
  0x72   :  { %248 = vsyncpa [#allocation8 + $0x1], 1 }

</bundles_post_ra>
